<compile_context>
chip_gen: v7x
topology: tpu7x:2x2x1
jax: 0.10.0
libtpu: 0.0.40
codegen_flags: <defaults>
</compile_context>

<pallas_src>
import functools

import jax
import jax.numpy as jnp
import numpy as np
from jax import lax
from jax.experimental import pallas as pl
from jax.experimental.pallas import tpu as pltpu

_ATTR = 18   # A0 B0 C0 | A1 B1 C1 | Az Bz Cz | Ar Br Cr | Ag Bg Cg | Ab Bb Cb
_Z_FAR = 1e10


def _plane_coeffs(v0, v1, v2, A0, B0, C0, A1, B1, C1):
    """Affine plane a + b*x + c*y that interpolates (v0, v1, v2) over the face."""
    a = v2 + (v0 - v2) * A0 + (v1 - v2) * A1
    b = (v0 - v2) * B0 + (v1 - v2) * B1
    c = (v0 - v2) * C0 + (v1 - v2) * C1
    return a, b, c


def _build_face_table(face_verts_h, face_colors, cam):
    """XLA-side per-face setup.

    Returns:
      tab   : (N*18, F) f32 plane-coefficient table (invalid faces sanitized so
              their inside test is always false).
      valid : (N, F) bool  non-degenerate & every vertex in front of camera.
      ymin, ymax : (N, F) f32 NDC-y extent per face (for tile bucketing).
    """
    n, fv, _ = face_verts_h.shape
    num_faces = fv // 3
    clip = jnp.einsum("nvk,nkl->nvl", face_verts_h.astype(jnp.float32),
                      cam.astype(jnp.float32))                     # (N, F*3, 4)
    wcl = clip[..., 3]
    safe_w = jnp.where(jnp.abs(wcl) < 1e-12, 1.0, wcl)
    ndc_x = clip[..., 0] / safe_w
    ndc_y = clip[..., 1] / safe_w
    x = ndc_x.reshape(n, num_faces, 3)
    y = ndc_y.reshape(n, num_faces, 3)
    d = wcl.reshape(n, num_faces, 3)                               # depth (=w)
    x0, x1, x2 = x[..., 0], x[..., 1], x[..., 2]
    y0, y1, y2 = y[..., 0], y[..., 1], y[..., 2]
    z0, z1, z2 = d[..., 0], d[..., 1], d[..., 2]

    area = (x1 - x0) * (y2 - y0) - (x2 - x0) * (y1 - y0)
    dmin = jnp.minimum(jnp.minimum(z0, z1), z2)
    # Per-face validity replaces the per-pixel z>0 test (a face with all vertex
    # depths > 0 has interpolated z > 0 everywhere inside it).
    valid = (jnp.abs(area) >= 1e-8) & (dmin > 1e-8)
    inv_area = jnp.where(valid, 1.0 / jnp.where(valid, area, 1.0), 0.0)

    # Screen-space barycentric planes: w0 = A0 + B0*x + C0*y ; w1 = ... ;
    # w2 = 1 - w0 - w1.
    A0 = (x1 * y2 - x2 * y1) * inv_area
    B0 = (y1 - y2) * inv_area
    C0 = (x2 - x1) * inv_area
    A1 = (x2 * y0 - x0 * y2) * inv_area
    B1 = (y2 - y0) * inv_area
    C1 = (x0 - x2) * inv_area

    Az, Bz, Cz = _plane_coeffs(z0, z1, z2, A0, B0, C0, A1, B1, C1)
    c = face_colors.astype(jnp.float32).reshape(n, num_faces, 3, 4)
    Ar, Br, Cr = _plane_coeffs(c[..., 0, 0], c[..., 1, 0], c[..., 2, 0],
                               A0, B0, C0, A1, B1, C1)
    Ag, Bg, Cg = _plane_coeffs(c[..., 0, 1], c[..., 1, 1], c[..., 2, 1],
                               A0, B0, C0, A1, B1, C1)
    Ab, Bb, Cb = _plane_coeffs(c[..., 0, 2], c[..., 1, 2], c[..., 2, 2],
                               A0, B0, C0, A1, B1, C1)

    rows = [A0, B0, C0, A1, B1, C1, Az, Bz, Cz,
            Ar, Br, Cr, Ag, Bg, Cg, Ab, Bb, Cb]
    # Sanitize invalid faces: force w0 = -1 everywhere, zero everything else
    # (no NaNs can reach the kernel even if such a face is ever iterated).
    san = []
    for i, r in enumerate(rows):
        fill = -1.0 if i == 0 else 0.0
        san.append(jnp.where(valid, r, fill))
    tab = jnp.stack(san, axis=1).reshape(n * _ATTR, num_faces)     # (N*18, F)
    tab = tab.astype(jnp.float32)

    ymin = jnp.minimum(jnp.minimum(y0, y1), y2)
    ymax = jnp.maximum(jnp.maximum(y0, y1), y2)
    return tab, valid, ymin, ymax


def _bucket_faces(valid, ymin, ymax, height, tile_h):
    """Per-(mesh, row-tile) face lists.

    Returns counts (N*T,) int32 and face ids (N*T*F,) int32 (overlapping faces
    first, original order preserved by a stable sort so first-face-wins z-tie
    behavior matches the reference).
    """
    num_tiles = height // tile_h
    row0 = jnp.arange(num_tiles, dtype=jnp.float32) * tile_h
    tile_ymin = (row0 + 0.5) * (2.0 / height) - 1.0
    tile_ymax = (row0 + (tile_h - 1) + 0.5) * (2.0 / height) - 1.0
    margin = 2.0 / height                        # one extra pixel of slack
    overlap = ((ymin[:, None, :] <= tile_ymax[None, :, None] + margin) &
               (ymax[:, None, :] >= tile_ymin[None, :, None] - margin) &
               valid[:, None, :])                                  # (N, T, F)
    counts = jnp.sum(overlap, axis=-1).astype(jnp.int32)           # (N, T)
    key = jnp.logical_not(overlap).astype(jnp.int32)
    ids = jnp.argsort(key, axis=-1, stable=True).astype(jnp.int32)  # (N, T, F)
    return counts.reshape(-1), ids.reshape(-1)


def _raster_kernel(counts_ref, ids_ref, tab_ref, out_ref, *,
                   num_faces, tile_h, height, width):
    b = pl.program_id(0)
    t = pl.program_id(1)
    num_tiles = pl.num_programs(1)
    base = b * _ATTR
    ids_base = (b * num_tiles + t) * num_faces
    row0 = t * tile_h

    # Pixel-center NDC coordinates for this image-row tile (hoisted out of the
    # face loop).
    iy = lax.broadcasted_iota(jnp.int32, (tile_h, width), 0) + row0
    jx = lax.broadcasted_iota(jnp.int32, (tile_h, width), 1)
    xp = (jx.astype(jnp.float32) + 0.5) * (2.0 / width) - 1.0
    yp = (iy.astype(jnp.float32) + 0.5) * (2.0 / height) - 1.0

    def body(i, carry):
        zb, rp, gp, bp = carry
        # All per-face setup is scalar SMEM reads (scalar unit), then broadcast.
        f = ids_ref[ids_base + i]
        a0 = tab_ref[base + 0, f]
        b0 = tab_ref[base + 1, f]
        c0 = tab_ref[base + 2, f]
        a1 = tab_ref[base + 3, f]
        b1 = tab_ref[base + 4, f]
        c1 = tab_ref[base + 5, f]
        az = tab_ref[base + 6, f]
        bz = tab_ref[base + 7, f]
        cz = tab_ref[base + 8, f]
        ar = tab_ref[base + 9, f]
        br = tab_ref[base + 10, f]
        cr = tab_ref[base + 11, f]
        ag = tab_ref[base + 12, f]
        bg = tab_ref[base + 13, f]
        cg = tab_ref[base + 14, f]
        ab = tab_ref[base + 15, f]
        bb = tab_ref[base + 16, f]
        cb = tab_ref[base + 17, f]

        w0 = a0 + b0 * xp + c0 * yp
        w1 = a1 + b1 * xp + c1 * yp
        w2 = 1.0 - w0 - w1
        z = az + bz * xp + cz * yp
        closer = (jnp.minimum(jnp.minimum(w0, w1), w2) >= 0.0) & (z < zb)
        zb = jnp.where(closer, z, zb)
        rp = jnp.where(closer, ar + br * xp + cr * yp, rp)
        gp = jnp.where(closer, ag + bg * xp + cg * yp, gp)
        bp = jnp.where(closer, ab + bb * xp + cb * yp, bp)
        return zb, rp, gp, bp

    init = (jnp.full((tile_h, width), _Z_FAR, jnp.float32),
            jnp.zeros((tile_h, width), jnp.float32),
            jnp.zeros((tile_h, width), jnp.float32),
            jnp.zeros((tile_h, width), jnp.float32))
    # Dynamic trip count: only the faces whose y-bbox overlaps this row tile.
    count = counts_ref[b * num_tiles + t]
    zbuf, rpl, gpl, bpl = lax.fori_loop(0, count, body, init)

    # SoA channel-plane stores (lane-dense over W); alpha written once.
    out_ref[0, 0] = rpl
    out_ref[0, 1] = gpl
    out_ref[0, 2] = bpl
    out_ref[0, 3] = (zbuf < _Z_FAR).astype(jnp.float32)


def mesh_renderer_forward(face_verts_h, face_colors, cam, image_size, tile_h=None):
    """Pallas MeshRenderer.forward: rasterize + shade a batch of meshes."""
    n, fv, _ = face_verts_h.shape
    num_faces = fv // 3
    h = w = int(image_size)
    if tile_h is None:
        tile_h = min(h, 64)          # keep tile_h*W modest -> carries stay hot
    tile_h = min(tile_h, h)
    assert h % tile_h == 0, "image height must be divisible by tile_h"
    assert tile_h % 8 == 0 or tile_h == h, "tile_h must be a multiple of 8"
    num_tiles = h // tile_h

    tab, valid, ymin, ymax = _build_face_table(face_verts_h, face_colors, cam)
    counts, ids = _bucket_faces(valid, ymin, ymax, h, tile_h)

    kernel = functools.partial(
        _raster_kernel, num_faces=num_faces, tile_h=tile_h, height=h, width=w)

    flops = int(40 * n * num_faces * h * w)
    bytes_accessed = int(4 * (tab.size + counts.size + ids.size + n * 4 * h * w))

    planes = pl.pallas_call(
        kernel,
        out_shape=jax.ShapeDtypeStruct((n, 4, h, w), jnp.float32),
        grid_spec=pltpu.PrefetchScalarGridSpec(
            num_scalar_prefetch=2,                      # counts, face ids (SMEM)
            grid=(n, num_tiles),
            in_specs=[pl.BlockSpec(memory_space=pltpu.MemorySpace.SMEM)],
            out_specs=pl.BlockSpec((1, 4, tile_h, w),
                                   lambda b, t, counts, ids: (b, 0, t, 0)),
        ),
        compiler_params=pltpu.CompilerParams(
            dimension_semantics=("parallel", "parallel")),
        cost_estimate=pl.CostEstimate(flops=flops, transcendentals=0,
                                      bytes_accessed=bytes_accessed),
    )(counts, ids, tab)

    # Back to the PyTorch3D NHWC (N, H, W, 4) convention (cheap XLA transpose).
    return jnp.transpose(planes, (0, 2, 3, 1))


def _reference_render(face_verts_h, face_colors, cam, image_size):
    """Pure numpy reference with identical (hard-raster, valid-face) semantics."""
    vh = np.asarray(face_verts_h, np.float32)
    cols = np.asarray(face_colors, np.float32)
    cam = np.asarray(cam, np.float32)
    n, fv, _ = vh.shape
    num_faces = fv // 3
    h = w = image_size
    out = np.zeros((n, h, w, 4), np.float32)

    iy, jx = np.meshgrid(np.arange(h, dtype=np.float32),
                         np.arange(w, dtype=np.float32), indexing="ij")
    xp = (jx + 0.5) * (2.0 / w) - 1.0
    yp = (iy + 0.5) * (2.0 / h) - 1.0

    for b in range(n):
        clip = vh[b] @ cam[b]
        wcl = clip[:, 3]
        safe_w = np.where(np.abs(wcl) < 1e-12, 1.0, wcl)
        ndc = clip[:, 0:2] / safe_w[:, None]
        zbuf = np.full((h, w), 1e10, np.float32)
        rgb = np.zeros((h, w, 3), np.float32)
        for f in range(num_faces):
            i0, i1, i2 = 3 * f, 3 * f + 1, 3 * f + 2
            x0, y0 = ndc[i0]
            x1, y1 = ndc[i1]
            x2, y2 = ndc[i2]
            z0, z1, z2 = wcl[i0], wcl[i1], wcl[i2]
            area = (x1 - x0) * (y2 - y0) - (x2 - x0) * (y1 - y0)
            if abs(area) < 1e-8 or min(z0, z1, z2) <= 1e-8:
                continue
            inv_area = np.float32(1.0) / area
            A0 = (x1 * y2 - x2 * y1) * inv_area
            B0 = (y1 - y2) * inv_area
            C0 = (x2 - x1) * inv_area
            A1 = (x2 * y0 - x0 * y2) * inv_area
            B1 = (y2 - y0) * inv_area
            C1 = (x0 - x2) * inv_area
            w0 = A0 + B0 * xp + C0 * yp
            w1 = A1 + B1 * xp + C1 * yp
            w2 = 1.0 - w0 - w1

            def plane(v0, v1, v2):
                a = v2 + (v0 - v2) * A0 + (v1 - v2) * A1
                bc = (v0 - v2) * B0 + (v1 - v2) * B1
                cc = (v0 - v2) * C0 + (v1 - v2) * C1
                return a + bc * xp + cc * yp

            z = plane(z0, z1, z2)
            closer = (np.minimum(np.minimum(w0, w1), w2) >= 0.0) & (z < zbuf)
            c0v, c1v, c2v = cols[b, i0, :3], cols[b, i1, :3], cols[b, i2, :3]
            color = np.stack([plane(c0v[k], c1v[k], c2v[k]) for k in range(3)],
                             axis=-1)
            zbuf = np.where(closer, z, zbuf)
            rgb = np.where(closer[..., None], color, rgb)
        out[b, ..., :3] = rgb
        out[b, ..., 3] = (zbuf < 1e10).astype(np.float32)
    return out


if __name__ == "__main__":
    N, F, IMG = 2, 8, 16  # batch of 2 meshes, 8 faces each, 16x16 images

    key = jax.random.PRNGKey(0)
    k_xy, k_z, k_rgb = jax.random.split(key, 3)

    # World-space face vertices, grouped as (N, F*3, .): xy in [-0.9, 0.9],
    # z (depth) in [1, 3] so everything is in front of the camera.
    xy = jax.random.uniform(k_xy, (N, F * 3, 2), jnp.float32, -0.9, 0.9)
    z = jax.random.uniform(k_z, (N, F * 3, 1), jnp.float32, 1.0, 3.0)
    ones = jnp.ones((N, F * 3, 1), jnp.float32)
    face_verts_h = jnp.concatenate([xy, z, ones], axis=-1)        # (N, F*3, 4)

    # Per-vertex RGBA colors (alpha = 1).
    rgb = jax.random.uniform(k_rgb, (N, F * 3, 3), jnp.float32, 0.0, 1.0)
    face_colors = jnp.concatenate([rgb, ones], axis=-1)           # (N, F*3, 4)

    # Deterministic per-batch pinhole cameras: clip = [f*x, f*y, z, z].
    def make_cam(focal):
        return np.array([[focal, 0.0, 0.0, 0.0],
                         [0.0, focal, 0.0, 0.0],
                         [0.0, 0.0, 1.0, 1.0],
                         [0.0, 0.0, 0.0, 0.0]], np.float32)
    cam = jnp.asarray(np.stack([make_cam(1.0), make_cam(1.2)]))   # (N, 4, 4)

    # tile_h=8 exercises the multi-tile (H-tiled, per-tile-culled) path.
    images = mesh_renderer_forward(face_verts_h, face_colors, cam, IMG, tile_h=8)
    images = jax.block_until_ready(images)

    ref = _reference_render(face_verts_h, face_colors, cam, IMG)
    np.testing.assert_allclose(np.asarray(images), ref, rtol=1e-3, atol=1e-3)

    assert images.shape == (N, IMG, IMG, 4)
    print("KERNEL_OK")
</pallas_src>

<mosaic_0001>
module attributes {stable_mosaic.version = 11 : i64} {
  func.func @_raster_kernel(%arg0: i32, %arg1: i32, %arg2: memref<4xi32, #tpu.memory_space<smem>>, %arg3: memref<32xi32, #tpu.memory_space<smem>>, %arg4: memref<36x8xf32, #tpu.memory_space<smem>>, %arg5: memref<1x4x8x16xf32, #tpu.memory_space<vmem>>) attributes {dimension_semantics = [#tpu.dimension_semantics<parallel>, #tpu.dimension_semantics<parallel>], iteration_bounds = array<i64: 2, 2>, scalar_prefetch = 2 : i64, scratch_operands = 0 : i64, tpu.core_type = #tpu.core_type<tc>, window_params = [{transform_indices = @transform_0, window_bounds = array<i64: 36, 8>}, {transform_indices = @transform_1, window_bounds = array<i64: 1, 4, 8, 16>}]} {
    %c18_i32 = arith.constant 18 : i32
    %0 = arith.muli %arg0, %c18_i32 : i32
    %c2_i32 = arith.constant 2 : i32
    %1 = arith.muli %arg0, %c2_i32 : i32
    %2 = arith.addi %1, %arg1 : i32
    %c8_i32 = arith.constant 8 : i32
    %3 = arith.muli %2, %c8_i32 : i32
    %c8_i32_0 = arith.constant 8 : i32
    %4 = arith.muli %arg1, %c8_i32_0 : i32
    %5 = tpu.iota {dimensions = array<i32: 0>} : vector<8x16xi32>
    %6 = vector.broadcast %4 : i32 to vector<8x16xi32>
    %7 = arith.addi %5, %6 : vector<8x16xi32>
    %8 = tpu.iota {dimensions = array<i32: 1>} : vector<8x16xi32>
    %9 = arith.sitofp %8 : vector<8x16xi32> to vector<8x16xf32>
    %cst = arith.constant 5.000000e-01 : f32
    %10 = vector.broadcast %cst : f32 to vector<8x16xf32>
    %11 = arith.addf %9, %10 : vector<8x16xf32>
    %cst_1 = arith.constant 1.250000e-01 : f32
    %12 = vector.broadcast %cst_1 : f32 to vector<8x16xf32>
    %13 = arith.mulf %11, %12 : vector<8x16xf32>
    %cst_2 = arith.constant 1.000000e+00 : f32
    %14 = vector.broadcast %cst_2 : f32 to vector<8x16xf32>
    %15 = arith.subf %13, %14 : vector<8x16xf32>
    %16 = arith.sitofp %7 : vector<8x16xi32> to vector<8x16xf32>
    %cst_3 = arith.constant 5.000000e-01 : f32
    %17 = vector.broadcast %cst_3 : f32 to vector<8x16xf32>
    %18 = arith.addf %16, %17 : vector<8x16xf32>
    %cst_4 = arith.constant 1.250000e-01 : f32
    %19 = vector.broadcast %cst_4 : f32 to vector<8x16xf32>
    %20 = arith.mulf %18, %19 : vector<8x16xf32>
    %cst_5 = arith.constant 1.000000e+00 : f32
    %21 = vector.broadcast %cst_5 : f32 to vector<8x16xf32>
    %22 = arith.subf %20, %21 : vector<8x16xf32>
    %cst_6 = arith.constant 1.000000e+10 : f32
    %23 = vector.broadcast %cst_6 : f32 to vector<8x16xf32>
    %cst_7 = arith.constant 0.000000e+00 : f32
    %24 = vector.broadcast %cst_7 : f32 to vector<8x16xf32>
    %cst_8 = arith.constant 0.000000e+00 : f32
    %25 = vector.broadcast %cst_8 : f32 to vector<8x16xf32>
    %cst_9 = arith.constant 0.000000e+00 : f32
    %26 = vector.broadcast %cst_9 : f32 to vector<8x16xf32>
    %c2_i32_10 = arith.constant 2 : i32
    %27 = arith.muli %arg0, %c2_i32_10 : i32
    %28 = arith.addi %27, %arg1 : i32
    %29 = arith.index_cast %28 : i32 to index
    %30 = memref.load %arg2[%29] : memref<4xi32, #tpu.memory_space<smem>>
    %c0_i32 = arith.constant 0 : i32
    %31 = arith.subi %30, %c0_i32 : i32
    %32 = arith.addi %c0_i32, %31 : i32
    %c1_i32 = arith.constant 1 : i32
    %33:4 = scf.for %arg6 = %c0_i32 to %32 step %c1_i32 iter_args(%arg7 = %23, %arg8 = %24, %arg9 = %25, %arg10 = %26) -> (vector<8x16xf32>, vector<8x16xf32>, vector<8x16xf32>, vector<8x16xf32>)  : i32 {
      %50 = arith.addi %3, %arg6 : i32
      %51 = arith.index_cast %50 : i32 to index
      %52 = memref.load %arg3[%51] : memref<32xi32, #tpu.memory_space<smem>>
      %c0_i32_24 = arith.constant 0 : i32
      %53 = arith.addi %0, %c0_i32_24 : i32
      %54 = arith.index_cast %53 : i32 to index
      %55 = arith.index_cast %52 : i32 to index
      %56 = memref.load %arg4[%54, %55] : memref<36x8xf32, #tpu.memory_space<smem>>
      %c1_i32_25 = arith.constant 1 : i32
      %57 = arith.addi %0, %c1_i32_25 : i32
      %58 = arith.index_cast %57 : i32 to index
      %59 = arith.index_cast %52 : i32 to index
      %60 = memref.load %arg4[%58, %59] : memref<36x8xf32, #tpu.memory_space<smem>>
      %c2_i32_26 = arith.constant 2 : i32
      %61 = arith.addi %0, %c2_i32_26 : i32
      %62 = arith.index_cast %61 : i32 to index
      %63 = arith.index_cast %52 : i32 to index
      %64 = memref.load %arg4[%62, %63] : memref<36x8xf32, #tpu.memory_space<smem>>
      %c3_i32 = arith.constant 3 : i32
      %65 = arith.addi %0, %c3_i32 : i32
      %66 = arith.index_cast %65 : i32 to index
      %67 = arith.index_cast %52 : i32 to index
      %68 = memref.load %arg4[%66, %67] : memref<36x8xf32, #tpu.memory_space<smem>>
      %c4_i32 = arith.constant 4 : i32
      %69 = arith.addi %0, %c4_i32 : i32
      %70 = arith.index_cast %69 : i32 to index
      %71 = arith.index_cast %52 : i32 to index
      %72 = memref.load %arg4[%70, %71] : memref<36x8xf32, #tpu.memory_space<smem>>
      %c5_i32 = arith.constant 5 : i32
      %73 = arith.addi %0, %c5_i32 : i32
      %74 = arith.index_cast %73 : i32 to index
      %75 = arith.index_cast %52 : i32 to index
      %76 = memref.load %arg4[%74, %75] : memref<36x8xf32, #tpu.memory_space<smem>>
      %c6_i32 = arith.constant 6 : i32
      %77 = arith.addi %0, %c6_i32 : i32
      %78 = arith.index_cast %77 : i32 to index
      %79 = arith.index_cast %52 : i32 to index
      %80 = memref.load %arg4[%78, %79] : memref<36x8xf32, #tpu.memory_space<smem>>
      %c7_i32 = arith.constant 7 : i32
      %81 = arith.addi %0, %c7_i32 : i32
      %82 = arith.index_cast %81 : i32 to index
      %83 = arith.index_cast %52 : i32 to index
      %84 = memref.load %arg4[%82, %83] : memref<36x8xf32, #tpu.memory_space<smem>>
      %c8_i32_27 = arith.constant 8 : i32
      %85 = arith.addi %0, %c8_i32_27 : i32
      %86 = arith.index_cast %85 : i32 to index
      %87 = arith.index_cast %52 : i32 to index
      %88 = memref.load %arg4[%86, %87] : memref<36x8xf32, #tpu.memory_space<smem>>
      %c9_i32 = arith.constant 9 : i32
      %89 = arith.addi %0, %c9_i32 : i32
      %90 = arith.index_cast %89 : i32 to index
      %91 = arith.index_cast %52 : i32 to index
      %92 = memref.load %arg4[%90, %91] : memref<36x8xf32, #tpu.memory_space<smem>>
      %c10_i32 = arith.constant 10 : i32
      %93 = arith.addi %0, %c10_i32 : i32
      %94 = arith.index_cast %93 : i32 to index
      %95 = arith.index_cast %52 : i32 to index
      %96 = memref.load %arg4[%94, %95] : memref<36x8xf32, #tpu.memory_space<smem>>
      %c11_i32 = arith.constant 11 : i32
      %97 = arith.addi %0, %c11_i32 : i32
      %98 = arith.index_cast %97 : i32 to index
      %99 = arith.index_cast %52 : i32 to index
      %100 = memref.load %arg4[%98, %99] : memref<36x8xf32, #tpu.memory_space<smem>>
      %c12_i32 = arith.constant 12 : i32
      %101 = arith.addi %0, %c12_i32 : i32
      %102 = arith.index_cast %101 : i32 to index
      %103 = arith.index_cast %52 : i32 to index
      %104 = memref.load %arg4[%102, %103] : memref<36x8xf32, #tpu.memory_space<smem>>
      %c13_i32 = arith.constant 13 : i32
      %105 = arith.addi %0, %c13_i32 : i32
      %106 = arith.index_cast %105 : i32 to index
      %107 = arith.index_cast %52 : i32 to index
      %108 = memref.load %arg4[%106, %107] : memref<36x8xf32, #tpu.memory_space<smem>>
      %c14_i32 = arith.constant 14 : i32
      %109 = arith.addi %0, %c14_i32 : i32
      %110 = arith.index_cast %109 : i32 to index
      %111 = arith.index_cast %52 : i32 to index
      %112 = memref.load %arg4[%110, %111] : memref<36x8xf32, #tpu.memory_space<smem>>
      %c15_i32 = arith.constant 15 : i32
      %113 = arith.addi %0, %c15_i32 : i32
      %114 = arith.index_cast %113 : i32 to index
      %115 = arith.index_cast %52 : i32 to index
      %116 = memref.load %arg4[%114, %115] : memref<36x8xf32, #tpu.memory_space<smem>>
      %c16_i32 = arith.constant 16 : i32
      %117 = arith.addi %0, %c16_i32 : i32
      %118 = arith.index_cast %117 : i32 to index
      %119 = arith.index_cast %52 : i32 to index
      %120 = memref.load %arg4[%118, %119] : memref<36x8xf32, #tpu.memory_space<smem>>
      %c17_i32 = arith.constant 17 : i32
      %121 = arith.addi %0, %c17_i32 : i32
      %122 = arith.index_cast %121 : i32 to index
      %123 = arith.index_cast %52 : i32 to index
      %124 = memref.load %arg4[%122, %123] : memref<36x8xf32, #tpu.memory_space<smem>>
      %125 = vector.broadcast %60 : f32 to vector<8x16xf32>
      %126 = arith.mulf %125, %15 : vector<8x16xf32>
      %127 = vector.broadcast %56 : f32 to vector<8x16xf32>
      %128 = arith.addf %127, %126 : vector<8x16xf32>
      %129 = vector.broadcast %64 : f32 to vector<8x16xf32>
      %130 = arith.mulf %129, %22 : vector<8x16xf32>
      %131 = arith.addf %128, %130 : vector<8x16xf32>
      %132 = vector.broadcast %72 : f32 to vector<8x16xf32>
      %133 = arith.mulf %132, %15 : vector<8x16xf32>
      %134 = vector.broadcast %68 : f32 to vector<8x16xf32>
      %135 = arith.addf %134, %133 : vector<8x16xf32>
      %136 = vector.broadcast %76 : f32 to vector<8x16xf32>
      %137 = arith.mulf %136, %22 : vector<8x16xf32>
      %138 = arith.addf %135, %137 : vector<8x16xf32>
      %cst_28 = arith.constant 1.000000e+00 : f32
      %139 = vector.broadcast %cst_28 : f32 to vector<8x16xf32>
      %140 = arith.subf %139, %131 : vector<8x16xf32>
      %141 = arith.subf %140, %138 : vector<8x16xf32>
      %142 = vector.broadcast %84 : f32 to vector<8x16xf32>
      %143 = arith.mulf %142, %15 : vector<8x16xf32>
      %144 = vector.broadcast %80 : f32 to vector<8x16xf32>
      %145 = arith.addf %144, %143 : vector<8x16xf32>
      %146 = vector.broadcast %88 : f32 to vector<8x16xf32>
      %147 = arith.mulf %146, %22 : vector<8x16xf32>
      %148 = arith.addf %145, %147 : vector<8x16xf32>
      %149 = arith.minimumf %131, %138 : vector<8x16xf32>
      %150 = arith.minimumf %149, %141 : vector<8x16xf32>
      %cst_29 = arith.constant 0.000000e+00 : f32
      %151 = vector.broadcast %cst_29 : f32 to vector<8x16xf32>
      %152 = arith.cmpf oge, %150, %151 : vector<8x16xf32>
      %153 = arith.cmpf olt, %148, %arg7 : vector<8x16xf32>
      %154 = arith.andi %152, %153 : vector<8x16xi1>
      %155 = arith.select %154, %148, %arg7 : vector<8x16xi1>, vector<8x16xf32>
      %156 = vector.broadcast %96 : f32 to vector<8x16xf32>
      %157 = arith.mulf %156, %15 : vector<8x16xf32>
      %158 = vector.broadcast %92 : f32 to vector<8x16xf32>
      %159 = arith.addf %158, %157 : vector<8x16xf32>
      %160 = vector.broadcast %100 : f32 to vector<8x16xf32>
      %161 = arith.mulf %160, %22 : vector<8x16xf32>
      %162 = arith.addf %159, %161 : vector<8x16xf32>
      %163 = arith.select %154, %162, %arg8 : vector<8x16xi1>, vector<8x16xf32>
      %164 = vector.broadcast %108 : f32 to vector<8x16xf32>
      %165 = arith.mulf %164, %15 : vector<8x16xf32>
      %166 = vector.broadcast %104 : f32 to vector<8x16xf32>
      %167 = arith.addf %166, %165 : vector<8x16xf32>
      %168 = vector.broadcast %112 : f32 to vector<8x16xf32>
      %169 = arith.mulf %168, %22 : vector<8x16xf32>
      %170 = arith.addf %167, %169 : vector<8x16xf32>
      %171 = arith.select %154, %170, %arg9 : vector<8x16xi1>, vector<8x16xf32>
      %172 = vector.broadcast %120 : f32 to vector<8x16xf32>
      %173 = arith.mulf %172, %15 : vector<8x16xf32>
      %174 = vector.broadcast %116 : f32 to vector<8x16xf32>
      %175 = arith.addf %174, %173 : vector<8x16xf32>
      %176 = vector.broadcast %124 : f32 to vector<8x16xf32>
      %177 = arith.mulf %176, %22 : vector<8x16xf32>
      %178 = arith.addf %175, %177 : vector<8x16xf32>
      %179 = arith.select %154, %178, %arg10 : vector<8x16xi1>, vector<8x16xf32>
      scf.yield %155, %163, %171, %179 : vector<8x16xf32>, vector<8x16xf32>, vector<8x16xf32>, vector<8x16xf32>
    }
    %c0 = arith.constant 0 : index
    %c0_11 = arith.constant 0 : index
    %c0_12 = arith.constant 0 : index
    %c0_13 = arith.constant 0 : index
    %34 = vector.load %arg5[%c0, %c0_11, %c0_12, %c0_13] : memref<1x4x8x16xf32, #tpu.memory_space<vmem>>, vector<1x1x8x16xf32>
    %35 = vector.shape_cast %34 : vector<1x1x8x16xf32> to vector<8x16xf32>
    %36 = vector.shape_cast %33#1 : vector<8x16xf32> to vector<1x1x8x16xf32>
    tpu.vector_store %arg5[%c0, %c0_11, %c0_12, %c0_13], %36 {strides = array<i32>} : memref<1x4x8x16xf32, #tpu.memory_space<vmem>>, vector<1x1x8x16xf32>,
    %c0_14 = arith.constant 0 : index
    %c1 = arith.constant 1 : index
    %c0_15 = arith.constant 0 : index
    %c0_16 = arith.constant 0 : index
    %37 = vector.load %arg5[%c0_14, %c1, %c0_15, %c0_16] : memref<1x4x8x16xf32, #tpu.memory_space<vmem>>, vector<1x1x8x16xf32>
    %38 = vector.shape_cast %37 : vector<1x1x8x16xf32> to vector<8x16xf32>
    %39 = vector.shape_cast %33#2 : vector<8x16xf32> to vector<1x1x8x16xf32>
    tpu.vector_store %arg5[%c0_14, %c1, %c0_15, %c0_16], %39 {strides = array<i32>} : memref<1x4x8x16xf32, #tpu.memory_space<vmem>>, vector<1x1x8x16xf32>,
    %c0_17 = arith.constant 0 : index
    %c2 = arith.constant 2 : index
    %c0_18 = arith.constant 0 : index
    %c0_19 = arith.constant 0 : index
    %40 = vector.load %arg5[%c0_17, %c2, %c0_18, %c0_19] : memref<1x4x8x16xf32, #tpu.memory_space<vmem>>, vector<1x1x8x16xf32>
    %41 = vector.shape_cast %40 : vector<1x1x8x16xf32> to vector<8x16xf32>
    %42 = vector.shape_cast %33#3 : vector<8x16xf32> to vector<1x1x8x16xf32>
    tpu.vector_store %arg5[%c0_17, %c2, %c0_18, %c0_19], %42 {strides = array<i32>} : memref<1x4x8x16xf32, #tpu.memory_space<vmem>>, vector<1x1x8x16xf32>,
    %cst_20 = arith.constant 1.000000e+10 : f32
    %43 = vector.broadcast %cst_20 : f32 to vector<8x16xf32>
    %44 = arith.cmpf olt, %33#0, %43 : vector<8x16xf32>
    %45 = arith.extui %44 : vector<8x16xi1> to vector<8x16xi32>
    %46 = arith.sitofp %45 : vector<8x16xi32> to vector<8x16xf32>
    %c0_21 = arith.constant 0 : index
    %c3 = arith.constant 3 : index
    %c0_22 = arith.constant 0 : index
    %c0_23 = arith.constant 0 : index
    %47 = vector.load %arg5[%c0_21, %c3, %c0_22, %c0_23] : memref<1x4x8x16xf32, #tpu.memory_space<vmem>>, vector<1x1x8x16xf32>
    %48 = vector.shape_cast %47 : vector<1x1x8x16xf32> to vector<8x16xf32>
    %49 = vector.shape_cast %46 : vector<8x16xf32> to vector<1x1x8x16xf32>
    tpu.vector_store %arg5[%c0_21, %c3, %c0_22, %c0_23], %49 {strides = array<i32>} : memref<1x4x8x16xf32, #tpu.memory_space<vmem>>, vector<1x1x8x16xf32>,
    return
  }
  func.func @transform_0(%arg0: i32, %arg1: i32, %arg2: memref<4xi32, #tpu.memory_space<smem>>, %arg3: memref<32xi32, #tpu.memory_space<smem>>) -> (i32, i32) {
    %c0_i32 = arith.constant 0 : i32
    %c0_i32_0 = arith.constant 0 : i32
    %c0_i32_1 = arith.constant 0 : i32
    return %c0_i32, %c0_i32_0 : i32, i32
  }
  func.func @transform_1(%arg0: i32, %arg1: i32, %arg2: memref<4xi32, #tpu.memory_space<smem>>, %arg3: memref<32xi32, #tpu.memory_space<smem>>) -> (i32, i32, i32, i32) {
    %c0_i32 = arith.constant 0 : i32
    %c0_i32_0 = arith.constant 0 : i32
    %c0_i32_1 = arith.constant 0 : i32
    return %arg0, %c0_i32, %arg1, %c0_i32_0 : i32, i32, i32, i32
  }
}

</mosaic_0001>

<bundles_post_ra>
// kernel: tpu_custom_call.1
= control target key start
LH: loop header
LB: loop body
LE: loop exit
PB: predicated region body
PF: predicated region fallthrough
CT: control target
= control target key end

     0   :  { %s1255_s0 = inlined_call_operand.vmem [shape: s32[4], index: 0, kind: input, shape index: {}]   ;;  %s1256_s2 = inlined_call_operand.vmem [shape: f32[36,8], index: 2, kind: input, shape index: {}]   ;;  %s1257_s3 = inlined_call_operand.hbm [shape: f32[2,4,16,16], index: 3, kind: output, shape index: {}]   ;;  %s1258_s1 = inlined_call_operand.vmem [shape: s32[32], index: 1, kind: input, shape index: {}]  }
   0x1   :  { %1267 = sst [smem:[#allocation20_spill]] %s1256_s2  ;;  %s8_s14 = sshll.u32 %s1255_s0, 4  ;;  %s9_s14 = int_to_ptr.vmem [resolvable:$true] %s8_s14 }
   0x2   :  { %s12_s17 = sshll.u32 %s1258_s1, 4  ;;  %s635_s18 = scalar_lea.vmem %s9_s14, 16  ;;  %s13_s17 = int_to_ptr.vmem [resolvable:$true] %s12_s17 }
   0x3   :  { %p636_p0 = scmp.ne.s32.totalorder %s9_s14, %s635_s18  ;;  %p640_p1 = scmp.lt.s32.totalorder %s9_s14, %s9_s14 }
   0x4   :  { %p641_p2 = scmp.lt.s32.totalorder %s635_s18, %s635_s18 }
   0x6   :  { %p642_p3 = por %p641_p2, %p640_p1 }
   0x8   :  { %p643_p4 = pnand %p642_p3, %p636_p0 }
   0xa   :  { %646 = shalt.err (!%p643_p4)  }
   0xb   :  { %s848_s19 = smov [#allocation3]   ;;  %s647_s20 = scalar_lea.vmem %s13_s17, 16 }
   0xc   :  { %11 = dma.vmem_to_smem %s9_s14, 16, %s848_s19, [#allocation2] }
   0xd   :  { %p648_p5 = scmp.ne.s32.totalorder %s13_s17, %s647_s20  ;;  %p652_p6 = scmp.lt.s32.totalorder %s13_s17, %s13_s17 }
   0xe   :  { %p653_p7 = scmp.lt.s32.totalorder %s647_s20, %s647_s20 }
  0x10   :  { %p654_p8 = por %p653_p7, %p652_p6 }
  0x12   :  { %p655_p9 = pnand %p654_p8, %p648_p5 }
  0x14   :  { %658 = shalt.err (!%p655_p9)  }
  0x15   :  { %s849_s0 = smov [#allocation4]  }
  0x16   :  { %15 = dma.vmem_to_smem %s13_s17, 16, %s849_s0, [#allocation2] }
  0x17   :  { %770 = dma.done.wait [#allocation2], 32 }
  0x18   :  { %771 = vsyncadd [#allocation2], 4294967264 }
  0x19   :  { %17 = sfence }
  0x1a   :  { %18 = vsyncpa [#allocation7], 0 }
  0x1b   :  { %19 = vsyncpa [#allocation6], 0 }
  0x1c   :  { %21 = vsyncpa [#allocation6 + $0x1], 0  ;;  %s884_s1 = smov 0   ;;  %s886_s21 = smov 0  }
  0x1d   :  { %s888_s22 = smov 0   ;;  %s890_s23 = smov 0  }
  0x1e   :  { %s892_s24 = smov 0   ;;  %s894_s25 = smov 0  }
  0x1f   :  { %s896_s26 = smov 0   ;;  %s898_s27 = smov 0  }
  0x20 LB: > { %1268 = sst [smem:[#allocation12_spill]] %s790_s22  ;;  %s433_s28 = sadd.s32 4294967295, %s810_s27   ;;  %s810_s27 = sphi %s898_s27, %s27_s27   ;;  %s806_s26 = sphi %s896_s26, %s1313_s26   ;;  %s802_s25 = sphi %s894_s25, %s1312_s25   ;;  %s798_s24 = sphi %s892_s24, %s1311_s24   ;;  %s794_s23 = sphi %s890_s23, %s1310_s23   ;;  %s790_s22 = sphi %s888_s22, %s1309_s22   ;;  %s786_s21 = sphi %s886_s21, %s1315_s21   ;;  %s782_s1 = sphi %s884_s1, %s1314_s1  }
  0x21   : > { %1269 = sst [smem:[#allocation13_spill]] %s802_s25  ;;  %s434_s29 = sadd.s32 4294967294, %s810_s27  }
  0x22   : > { %1270 = sst [smem:[#allocation14_spill]] %s806_s26  ;;  %s36_s30 = sadd.s32 1, %s802_s25 }
  0x23   : > { %s39_s4 = sadd.s32 1, %s806_s26  ;;  %p37_p10 = scmp.ge.s32.totalorder %s36_s30, 2 }
  0x24   : > { %s69_s5 = sadd.s32 1, %s790_s22  ;;  %p79_p11 = scmp.ne.s32.totalorder %s790_s22, %s786_s21 }
  0x25   : > { %p80_p12 = scmp.eq.s32.totalorder %s433_s28, 3  ;;  %s1317_s30 = smov (%p37_p10, %s36_s30), 0 }
  0x26   : > { %1271 = sst [smem:[#allocation15_spill]] %s1317_s30  ;;  %s1319_s4 = smov (!%p37_p10, %s39_s4), %s806_s26 }
  0x27   : > { %s65_s6 = ssub.s32 %s802_s25, %s1317_s30  ;;  %p936_p13 = por %p80_p12, %p79_p11 }
  0x28   : > { %p41_p0 = scmp.ge.s32.totalorder %s1319_s4, 2  ;;  %p85_p1 = scmp.ne.s32.totalorder %s786_s21, %s782_s1 }
  0x29   : > { %p86_p2 = scmp.eq.s32.totalorder %s434_s29, 3  ;;  %p435_p3 = scmp.ge.s32.totalorder %s810_s27, 1 }
  0x2a   : > { %s1321_s4 = smov (%p41_p0, %s1319_s4), 0  ;;  %p93_p5 = scmp.lt.s32.totalorder %s810_s27, 5 }
  0x2b   : > { %1273 = sst [smem:[#allocation16_spill]] %s1321_s4  ;;  %p945_p4 = por %p86_p2, %p85_p1 }
  0x2c   : > { %s64_s9 = ssub.s32 %s806_s26, %s1321_s4  ;;  %p952_p6 = pnand %p435_p3, %p93_p5 }
  0x2d   : > { %s1274_s8 = scalar_select %p945_p4, 1, 0 }
  0x2e   : > { %s66_s10 = sor.u32 %s65_s6, %s64_s9  ;;  %p956_p8 = scmp.eq.s32.totalorder %s433_s28, 0 }
  0x2f   : > { %1275 = sst [smem:[#allocation17_spill]] %s1274_s8  ;;  %p67_p7 = scmp.eq.s32.totalorder %s66_s10, 0 }
  0x30   : > { %p479_p9 = pneg %p952_p6  ;;  %s1278_s2 = sld [smem:[#allocation20_spill]] }
  0x31   : > { %s966_s16 = scalar_select %p67_p7, %s790_s22, %s69_s5  }
  0x32   : > { %p970_p10 = pnand %p956_p8, %p479_p9 }
  0x33   : > { %1279 = sst [smem:[#allocation18_spill]] %s966_s16 }
  0x34   : > { %p661_p12 = pneg %p970_p10 }
  0x36   : > { %s105_s15 = sshll.u32 %s1278_s2, 4  ;;  %s106_s15 = int_to_ptr.vmem [resolvable:$true] %s105_s15 }
  0x37   : > { %s659_s18 = scalar_lea.vmem %s106_s15, 640  ;;  %p667_p2 = scmp.lt.s32.totalorder %s106_s15, %s106_s15 }
  0x38   : > { %p660_p11 = scmp.ne.s32.totalorder %s106_s15, %s659_s18  ;;  %p668_p3 = scmp.lt.s32.totalorder %s659_s18, %s659_s18 }
  0x3a   : > { %p662_p0 = pnand %p661_p12, %p660_p11  ;;  %p669_p5 = por %p668_p3, %p667_p2 }
  0x3c   : > { %p663_p1 = pneg %p662_p0 }
  0x3e   : > { %p670_p4 = pnand %p669_p5, %p663_p1 }
  0x40   : > { %673 = shalt.err (!%p670_p4)
}
  0x41   : > { %s850_s19 = smov [#allocation5]   ;;  %s851_s20 = smov 128  }
  0x42   : > { %s852_s0 = smov 8   ;;  %121 = sbr.rel (%p952_p6) target bundleno = 194 (0xc2), region = 24 }
  0x43   : > { %482 = dma.vmem_to_smem (!%p970_p10), %s106_s15, 640, %s850_s19, [#allocation7], %s851_s20, %s851_s20, %s852_s0  }
  0x49   : > { %773 = dma.done.wait (%p956_p8), [#allocation7], 640  }
  0x4a   : > { %775 = vsyncadd (%p956_p8), [#allocation7], 4294966656 }
  0x4b   : > { %127 = sfence }
  0x4c   : > { %s1259_s28 = sand.u32 1, %s786_s21   ;;  %s986_s29 = smul.u32 18, %s798_s24  ;;  %v142_v0 = vlaneseq  ;;  %v1006_v13 = vmov 0.0   ;;  %v1008_v14 = vmov 0.0   ;;  %v1010_v15 = vmov 0.0  }
  0x4d   : > { %s439_s5 = sshll.u32 %s1259_s28, 5  ;;  %s440_s6 = sshll.u32 %s798_s24, 1  ;;  %v1012_v16 = vmov 1e+10  }
  0x4e   : > { %s992_s9 = sadd.s32 %s794_s23, %s440_s6  ;;  %v143_v1 = vshrl.u32 %v142_v0, 7  ;;  %v147_v2 = vand.u32 127, %v142_v0  ;;  %s442_s11 = sshll.u32 %s794_s23, 3 }
  0x4f   : > { %1281 = sst [smem:[#allocation19_spill]] %s992_s9  ;;  %v144_v3 = vstv %s442_s11  ;;  %s1003_s13 = scalar_lea.vmem [#allocation8], %s439_s5 }
  0x50   : > { %v148_v4 = vcvt.s32.f32 %v147_v2  ;;  %s997_s12 = sld [smem:[#allocation3 + %s992_s9]]  ;;  %v145_v5 = vadd.s32 %v144_v3, %v143_v1 }
  0x52   : > { %v149_v6 = vadd.f32 0.5, %v148_v4  ;;  %v152_v7 = vcvt.s32.f32 %v145_v5 }
  0x54   : > { %v150_v8 = vmul.f32 0.125, %v149_v6  ;;  %v153_v9 = vadd.f32 0.5, %v152_v7 }
  0x56   : > { %v999_v10 = vadd.f32 -1.0, %v150_v8  ;;  %v154_v11 = vmul.f32 0.125, %v153_v9  ;;  %p445_p4 = scmp.le.s32.totalorder %s997_s12, 0 }
  0x57   : > { %v1014_v17 = vmov (!%p445_p4), 0.0   ;;  %v1016_v18 = vmov (!%p445_p4), 0.0   ;;  %v1018_v19 = vmov (!%p445_p4), 0.0   ;;  %v1020_v20 = vmov (!%p445_p4), 1e+10   ;;  %s1022_s14 = smov (!%p445_p4), 0  }
  0x58   : > { %v1001_v12 = vadd.f32 -1.0, %v154_v11  ;;  %387 = sbr.rel (%p445_p4) target bundleno = 166 (0xa6), region = 65 }
  0x5f LB: >> { %s1282_s9 = sld [smem:[#allocation19_spill]]  ;;  %s177_s15 = sadd.s32 1, %s986_s29  ;;  %s830_s14 = sphi %s1022_s14, %s160_s14   ;;  %v826_v20 = vphi %v1020_v20, %v1300_v20   ;;  %v822_v19 = vphi %v1018_v19, %v1299_v19   ;;  %v818_v18 = vphi %v1016_v18, %v1298_v18   ;;  %v814_v17 = vphi %v1014_v17, %v1297_v17  }
  0x60   : >> { %s182_s17 = sadd.s32 2, %s986_s29  ;;  %s187_s19 = sadd.s32 3, %s986_s29 }
  0x65   : >> { %s1283_s10 = sshll.u32 %s1282_s9, 3 }
  0x66   : >> { %s167_s18 = sadd.s32 %s830_s14, %s1283_s10  ;;  %s160_s14 = sadd.s32 1, %s830_s14  }
  0x67   : >> { %s168_s20 = sld [smem:[#allocation4 + %s167_s18]]  ;;  %p159_p6 = scmp.ge.s32.totalorder %s160_s14, %s997_s12 }
  0x6d   : >> { %s1056_s22 = sshra.s32 %s168_s20, 7  ;;  %s1058_s10 = sand.u32 127, %s168_s20 }
  0x6e   : >> { %s171_s18 = sadd.s32 %s1056_s22, %s986_s29  ;;  %s178_s4 = sadd.s32 %s177_s15, %s1056_s22 }
  0x6f   : >> { %s446_s25 = sshll.u32 %s171_s18, 7  ;;  %s447_s16 = sshll.u32 %s178_s4, 7 }
  0x70   : >> { %s175_s26 = sadd.s32 %s446_s25, %s1058_s10  ;;  %s180_s30 = sadd.s32 %s447_s16, %s1058_s10 }
  0x71   : >> { %s176_s2 = sld [smem:[#allocation5 + %s175_s26]]  ;;  %s183_s20 = sadd.s32 %s182_s17, %s1056_s22 }
  0x72   : >> { %s181_s28 = sld [smem:[#allocation5 + %s180_s30]]  ;;  %s188_s11 = sadd.s32 %s187_s19, %s1056_s22 }
  0x73   : >> { %s448_s6 = sshll.u32 %s183_s20, 7  ;;  %s449_s5 = sshll.u32 %s188_s11, 7 }
  0x74   : >> { %s185_s0 = sadd.s32 %s448_s6, %s1058_s10  ;;  %s190_s15 = sadd.s32 %s449_s5, %s1058_s10 }
  0x75   : >> { %s186_s9 = sld [smem:[#allocation5 + %s185_s0]]  ;;  %s1284_s4 = sadd.s32 4, %s986_s29 }
  0x76   : >> { %s1069_s8 = sld [smem:[#allocation5 + %s190_s15]]  ;;  %s193_s25 = sadd.s32 %s1284_s4, %s1056_s22 }
  0x77   : >> { %s1285_s16 = sadd.s32 5, %s986_s29  ;;  %s450_s30 = sshll.u32 %s193_s25, 7  ;;  %v264_v22 = vstv %s176_s2 }
  0x78   : >> { %s198_s26 = sadd.s32 %s1285_s16, %s1056_s22  ;;  %v262_v21 = vstv %s181_s28  ;;  %s195_s19 = sadd.s32 %s450_s30, %s1058_s10 }
  0x79   : >> { %s451_s17 = sshll.u32 %s198_s26, 7  ;;  %v263_v23 = vmul.f32 %v999_v10, %v262_v21  ;;  %s196_s0 = sld [smem:[#allocation5 + %s195_s19]] }
  0x7a   : >> { %s200_s6 = sadd.s32 %s451_s17, %s1058_s10  ;;  %s1286_s11 = sadd.s32 6, %s986_s29 }
  0x7b   : >> { %s201_s5 = sld [smem:[#allocation5 + %s200_s6]]  ;;  %s203_s18 = sadd.s32 %s1286_s11, %s1056_s22  ;;  %v265_v24 = vadd.f32 %v264_v22, %v263_v23  ;;  %v266_v25 = vstv %s186_s9 }
  0x7c   : >> { %s1287_s20 = sadd.s32 7, %s986_s29  ;;  %s452_s4 = sshll.u32 %s203_s18, 7  ;;  %v267_v26 = vmul.f32 %v1001_v12, %v266_v25  ;;  %v271_v29 = vstv %s1069_s8 }
  0x7d   : >> { %s208_s15 = sadd.s32 %s1287_s20, %s1056_s22  ;;  %s205_s2 = sadd.s32 %s452_s4, %s1058_s10 }
  0x7e   : >> { %s453_s28 = sshll.u32 %s208_s15, 7  ;;  %s1089_s16 = sld [smem:[#allocation5 + %s205_s2]]  ;;  %v268_v27 = vadd.f32 %v267_v26, %v265_v24 }
  0x7f   : >> { %s210_s25 = sadd.s32 %s453_s28, %s1058_s10  ;;  %s1288_s30 = sadd.s32 8, %s986_s29  ;;  %v269_v28 = vstv %s196_s0 }
  0x80   : >> { %s211_s26 = sld [smem:[#allocation5 + %s210_s25]]  ;;  %s213_s17 = sadd.s32 %s1288_s30, %s1056_s22  ;;  %v270_v31 = vmul.f32 %v999_v10, %v269_v28  ;;  %v276_v34 = vsub.f32 1.0, %v268_v27 }
  0x81   : >> { %s1289_s19 = sadd.s32 9, %s986_s29  ;;  %s454_s11 = sshll.u32 %s213_s17, 7  ;;  %v273_v30 = vstv %s201_s5 }
  0x82   : >> { %s218_s6 = sadd.s32 %s1289_s19, %s1056_s22  ;;  %s215_s9 = sadd.s32 %s454_s11, %s1058_s10  ;;  %v274_v32 = vmul.f32 %v1001_v12, %v273_v30  ;;  %v272_v33 = vadd.f32 %v271_v29, %v270_v31 }
  0x83   : >> { %s455_s18 = sshll.u32 %s218_s6, 7  ;;  %s216_s15 = sld [smem:[#allocation5 + %s215_s9]] }
  0x84   : >> { %s220_s20 = sadd.s32 %s455_s18, %s1058_s10  ;;  %s1290_s28 = sadd.s32 10, %s986_s29  ;;  %v280_v36 = vstv %s1089_s16  ;;  %v275_v37 = vadd.f32 %v274_v32, %v272_v33 }
  0x85   : >> { %s1102_s4 = sld [smem:[#allocation5 + %s220_s20]]  ;;  %s223_s0 = sadd.s32 %s1290_s28, %s1056_s22 }
  0x86   : >> { %s1291_s2 = sadd.s32 11, %s986_s29  ;;  %s456_s5 = sshll.u32 %s223_s0, 7  ;;  %v278_v35 = vstv %s211_s26  ;;  %v277_v39 = vsub.f32 %v276_v34, %v275_v37  ;;  %v285_v41 = vmin.f32 %v268_v27, %v275_v37 }
  0x87   : >> { %s228_s8 = sadd.s32 %s1291_s2, %s1056_s22  ;;  %s225_s30 = sadd.s32 %s456_s5, %s1058_s10  ;;  %v279_v38 = vmul.f32 %v999_v10, %v278_v35 }
  0x88   : >> { %s457_s25 = sshll.u32 %s228_s8, 7  ;;  %s226_s19 = sld [smem:[#allocation5 + %s225_s30]]  ;;  %v286_v44 = vmin.f32 %v285_v41, %v277_v39 }
  0x89   : >> { %s230_s17 = sadd.s32 %s457_s25, %s1058_s10  ;;  %s1292_s11 = sadd.s32 12, %s986_s29  ;;  %v281_v40 = vadd.f32 %v280_v36, %v279_v38  ;;  %v282_v42 = vstv %s216_s15 }
  0x8a   : >> { %s231_s6 = sld [smem:[#allocation5 + %s230_s17]]  ;;  %s233_s18 = sadd.s32 %s1292_s11, %s1056_s22  ;;  %v283_v43 = vmul.f32 %v1001_v12, %v282_v42  ;;  %vm287_vm0 = vcmp.ge.f32.partialorder %v286_v44, 0.0 }
  0x8b   : >> { %s1293_s9 = sadd.s32 13, %s986_s29  ;;  %s458_s16 = sshll.u32 %s233_s18, 7  ;;  %v293_v47 = vstv %s1102_s4 }
  0x8c   : >> { %s238_s20 = sadd.s32 %s1293_s9, %s1056_s22  ;;  %s235_s28 = sadd.s32 %s458_s16, %s1058_s10  ;;  %v284_v45 = vadd.f32 %v283_v43, %v281_v40 }
  0x8d   : >> { %s459_s26 = sshll.u32 %s238_s20, 7  ;;  %s1123_s2 = sld [smem:[#allocation5 + %s235_s28]] }
  0x8e   : >> { %s240_s0 = sadd.s32 %s459_s26, %s1058_s10  ;;  %s1294_s5 = sadd.s32 14, %s986_s29  ;;  %v291_v46 = vstv %s226_s19  ;;  %vm288_vm1 = vcmp.lt.f32.partialorder %v284_v45, %v826_v20 }
  0x8f   : >> { %s241_s8 = sld [smem:[#allocation5 + %s240_s0]]  ;;  %s243_s25 = sadd.s32 %s1294_s5, %s1056_s22  ;;  %v292_v49 = vmul.f32 %v999_v10, %v291_v46  ;;  %vm1136_vm2 = vmand %vm287_vm0, %vm288_vm1 }
  0x90   : >> { %s247_s30 = sadd.s32 15, %s986_s29  ;;  %s460_s17 = sshll.u32 %s243_s25, 7  ;;  %v295_v48 = vstv %s231_s6  ;;  %v290_v52 = vsel %vm1136_vm2, %v284_v45, %v826_v20  }
  0x91   : >> { %s248_s11 = sadd.s32 %s247_s30, %s1056_s22  ;;  %s245_s15 = sadd.s32 %s460_s17, %s1058_s10  ;;  %v296_v50 = vmul.f32 %v1001_v12, %v295_v48  ;;  %v294_v53 = vadd.f32 %v293_v47, %v292_v49  ;;  %v1300_v20 = vmov %v290_v52  ;;  %v1304_v16 = vmov (%p159_p6), %v290_v52 }
  0x92   : >> { %s461_s18 = sshll.u32 %s248_s11, 7  ;;  %s246_s9 = sld [smem:[#allocation5 + %s245_s15]] }
  0x93   : >> { %s250_s20 = sadd.s32 %s461_s18, %s1058_s10  ;;  %s252_s19 = sadd.s32 16, %s986_s29  ;;  %v301_v55 = vstv %s1123_s2  ;;  %v297_v56 = vadd.f32 %v296_v50, %v294_v53 }
  0x94   : >> { %s251_s4 = sld [smem:[#allocation5 + %s250_s20]]  ;;  %s253_s6 = sadd.s32 %s252_s19, %s1056_s22 }
  0x95   : >> { %s257_s16 = sadd.s32 17, %s986_s29  ;;  %v299_v54 = vstv %s241_s8  ;;  %s462_s26 = sshll.u32 %s253_s6, 7  ;;  %v298_v58 = vsel %vm1136_vm2, %v297_v56, %v822_v19  }
  0x96   : >> { %s258_s28 = sadd.s32 %s257_s16, %s1056_s22  ;;  %v300_v57 = vmul.f32 %v999_v10, %v299_v54  ;;  %s255_s0 = sadd.s32 %s462_s26, %s1058_s10  ;;  %v1299_v19 = vmov %v298_v58  ;;  %v1303_v15 = vmov (%p159_p6), %v298_v58 }
  0x97   : >> { %s463_s5 = sshll.u32 %s258_s28, 7  ;;  %s256_s25 = sld [smem:[#allocation5 + %s255_s0]] }
  0x98   : >> { %s260_s30 = sadd.s32 %s463_s5, %s1058_s10  ;;  %v302_v59 = vadd.f32 %v301_v55, %v300_v57  ;;  %v303_v60 = vstv %s246_s9 }
  0x99   : >> { %s261_s17 = sld [smem:[#allocation5 + %s260_s30]]  ;;  %v304_v61 = vmul.f32 %v1001_v12, %v303_v60 }
  0x9a   : >> { %v309_v1 = vstv %s251_s4 }
  0x9b   : >> { %v305_v62 = vadd.f32 %v304_v61, %v302_v59 }
  0x9d   : >> { %v306_v63 = vsel %vm1136_vm2, %v305_v62, %v818_v18   ;;  %v307_v0 = vstv %s256_s25 }
  0x9e   : >> { %v308_v2 = vmul.f32 %v999_v10, %v307_v0  ;;  %v1298_v18 = vmov %v306_v63  ;;  %v1302_v14 = vmov (%p159_p6), %v306_v63 }
  0x9f   : >> { %v311_v3 = vstv %s261_s17  ;;  %162 = sbr.rel (!%p159_p6) target bundleno = 95 (0x5f), region = 71 }
  0xa0   : >> { %v312_v4 = vmul.f32 %v1001_v12, %v311_v3  ;;  %v310_v5 = vadd.f32 %v309_v1, %v308_v2 }
  0xa2   : >> { %v313_v6 = vadd.f32 %v312_v4, %v310_v5 }
  0xa4   : >> { %v314_v7 = vsel %vm1136_vm2, %v313_v6, %v814_v17  }
  0xa5   : >> { %v1297_v17 = vmov %v314_v7  ;;  %v1301_v13 = vmov (%p159_p6), %v314_v7 }
  0xa6 PF: > { %vm315_vm3 = vcmask 130048   ;;  %vm321_vm4 = vcmp.lt.f32.partialorder %v846_v16, 1e+10  ;;  %s469_s22 = sshll.u32 %s798_s24, 3  ;;  %v853_v8 = vmov 0.0   ;;  %s341_s10 = sshll.u32 %s1003_s13, 4  ;;  %v846_v16 = vphi %v1012_v16, %v1304_v16   ;;  %v842_v15 = vphi %v1010_v15, %v1303_v15   ;;  %v838_v14 = vphi %v1008_v14, %v1302_v14   ;;  %v834_v13 = vphi %v1006_v13, %v1301_v13   ;;  %s1194_s10 = int_to_ptr.vmem [resolvable:$true] %s341_s10 }
  0xa7   : > { %316 = vst.msk [vmem:[%s1003_s13] sm:$0xff] %vm315_vm3, %v842_v15  ;;  %464 = vst.msk [vmem:[%s1003_s13 + $0x8] sm:$0xff] %vm315_vm3, %v838_v14  ;;  %v466_v9 = vsel %vm321_vm4, 1.0, %v853_v8  ;;  %s338_s29 = sadd.s32 %s794_s23, %s469_s22  ;;  %s1305_s24 = sand.u32 1, %s786_s21  }
  0xa8   : > { %465 = vst.msk [vmem:[%s1003_s13 + $0x10] sm:$0xff] %vm315_vm3, %v834_v13  ;;  %467 = vst.msk [vmem:[%s1003_s13 + $0x18] sm:$0xff] %vm315_vm3, %v466_v9  ;;  %s470_s12 = sshll.u32 %s338_s29, 7  ;;  %s1203_s11 = scalar_lea.sflag [#allocation6], %s1305_s24 }
  0xa9   : > { %s1199_s8 = scalar_lea.hbm %s1257_s3, %s470_s12  ;;  %s674_s15 = scalar_lea.vmem %s1194_s10, 512 }
  0xaa   : > { %p675_p7 = scmp.ne.s32.totalorder %s1194_s10, %s674_s15  ;;  %s854_s23 = smov [#allocation8]  }
  0xab   : > { %s678_s13 = sshll.u32 %s854_s23, 4  ;;  %s679_s13 = int_to_ptr.vmem [resolvable:$false] %s678_s13 }
  0xac   : > { %p676_p8 = pnand %p675_p7, %p936_p13  ;;  %s680_s18 = scalar_lea.vmem %s679_s13, 1024 }
  0xad   : > { %p681_p10 = scmp.lt.s32.totalorder %s1194_s10, %s679_s13  ;;  %p682_p11 = scmp.lt.s32.totalorder %s680_s18, %s674_s15 }
  0xae   : > { %p677_p9 = pneg %p676_p8 }
  0xaf   : > { %p683_p12 = por %p682_p11, %p681_p10 }
  0xb1   : > { %p684_p0 = pnand %p683_p12, %p677_p9 }
  0xb3   : > { %687 = shalt.err (!%p684_p0)
}
  0xb4   : > { %s688_s9 = scalar_lea.hbm %s1199_s8, 512  ;;  %s692_s19 = scalar_lea.hbm %s1257_s3, 2048 }
  0xb5   : > { %p689_p1 = scmp.ne.s32.totalorder %s1199_s8, %s688_s9  ;;  %p693_p5 = scmp.lt.u32.totalorder %s1199_s8, %s1257_s3 }
  0xb6   : > { %p694_p4 = scmp.lt.u32.totalorder %s692_s19, %s688_s9  ;;  %p696_p7 = scmp.lt.u32.totalorder %s688_s9, %s1199_s8 }
  0xb7   : > { %p690_p2 = pnand %p689_p1, %p936_p13 }
  0xb8   : > { %p695_p6 = por %p694_p4, %p693_p5 }
  0xb9   : > { %p691_p3 = pneg %p690_p2 }
  0xba   : > { %p697_p8 = por %p696_p7, %p695_p6 }
  0xbc   : > { %p698_p9 = pnand %p697_p8, %p691_p3 }
  0xbe   : > { %701 = shalt.err (!%p698_p9)
}
  0xbf   : > { %s855_s26 = smov 128   ;;  %s856_s28 = smov 256  }
  0xc0   : > { %s857_s0 = smov 8  }
  0xc1   : > { %477 = dma.vmem_to_hbm [thread:$0]  (%p936_p13), %s1194_s10, 512, %s1199_s8, %s1203_s11, %s855_s26, %s856_s28, %s857_s0  }
  0xc2 PF: > { %s1306_s5 = sld [smem:[#allocation17_spill]]  ;;  %p489_p10 = scmp.ge.s32.totalorder %s810_s27, 2 }
  0xc3   : > { %s356_s25 = sand.u32 1, %s782_s1  }
  0xc4   : > { %s357_s30 = scalar_lea.sflag [#allocation6], %s356_s25 }
  0xc8   : > { %p1307_p11 = scmp.ne.s32.totalorder %s1306_s5, 0 }
  0xca   : > { %p484_p12 = pnand %p489_p10, %p1307_p11 }
  0xcc   : > { %777 = dma.done.wait (!%p484_p12), %s357_s30, 512  }
  0xcd   : > { %779 = vsyncadd (!%p484_p12), %s357_s30, 4294966784  ;;  %s27_s27 = sadd.s32 1, %s810_s27   ;;  %s1308_s17 = sld [smem:[#allocation12_spill]] }
  0xce   : > { %p24_p0 = scmp.ge.s32.totalorder %s27_s27, 6   ;;  %s1309_s22 = sld [smem:[#allocation18_spill]] }
  0xcf   : > { %s1310_s23 = sld [smem:[#allocation13_spill]]  ;;  %s1311_s24 = sld [smem:[#allocation14_spill]] }
  0xd0   : > { %s1312_s25 = sld [smem:[#allocation15_spill]]  ;;  %s1313_s26 = sld [smem:[#allocation16_spill]] }
  0xd1   : > { %s1314_s1 = smov %s786_s21  ;;  %26 = sbr.rel (!%p24_p0) target bundleno = 32 (0x20), region = 82 }
  0xd3   : > { %s1315_s21 = smov %s1308_s17 }
  0xd8   :  { %362 = vsyncpa [#allocation6], 1 }
  0xd9   :  { %364 = vsyncpa [#allocation6 + $0x1], 1 }
  0xda   :  { %365 = vsyncpa [#allocation7], 1 }
  0xdb   :  { %367 = vsyncpa [#allocation7 + $0x1], 1 }

</bundles_post_ra>
